<compile_context>
chip_gen: v7x
topology: tpu7x:2x2x1
jax: 0.10.0
libtpu: 0.0.40
codegen_flags: <defaults>
</compile_context>

<pallas_src>
import functools
import math

import jax
import jax.numpy as jnp
from jax.experimental import pallas as pl
from jax.experimental.pallas import tpu as pltpu
from jax.scipy.linalg import block_diag

F32 = jnp.float32
BF16 = jnp.bfloat16
LOG2 = math.log(2.0)


def _ssp(x):
    # ShiftedSoftplus: softplus(x) - log(2); f32 VPU/EUP math (v5e has no bf16 VPU).
    return jnp.maximum(x, 0.0) + jnp.log1p(jnp.exp(-jnp.abs(x))) - LOG2


def _layernorm(x, w, b, eps=1e-5):
    mu = jnp.mean(x, axis=-1, keepdims=True)
    var = jnp.mean((x - mu) ** 2, axis=-1, keepdims=True)
    return (x - mu) * jax.lax.rsqrt(var + eps) * w + b


def _bdot(a, w):
    # bf16 x bf16 -> f32 accumulation on the MXU (matches default-precision passes).
    return jnp.dot(a.astype(w.dtype), w, preferred_element_type=F32)


def _fdot(a, b):
    return jnp.dot(a, b, preferred_element_type=F32)


def _vmem_limit_bytes():
    try:
        cap = int(pltpu.get_tpu_info().vmem_capacity_bytes)
    except Exception:
        cap = 128 * 1024 * 1024
    return min(int(cap * 3 // 4), 96 * 1024 * 1024)


# --------------------------------------------------------------------------
# Host-side parameter-slab packing (one DMA per slab instead of ~30 tiny ones)
# --------------------------------------------------------------------------
def _pack_rows(entries, dtype, row_align):
    """Stack 2-D arrays along rows, zero-padding lanes to a common width and
    aligning each entry's row offset.  Returns (slab, {name: (row, nrows, ncols)})."""
    width = max(a.shape[1] for a in entries.values())
    parts, slots, off = [], {}, 0
    for name, a in entries.items():
        a = jnp.asarray(a).astype(dtype)
        r, c = a.shape
        rp = (-r) % row_align
        parts.append(jnp.pad(a, ((0, rp), (0, width - c))))
        slots[name] = (off, r, c)
        off += r + rp
    return jnp.concatenate(parts, axis=0), slots


# --------------------------------------------------------------------------
# Kernel 1: attention / scatter stage  ->  aggr [N, H]
# --------------------------------------------------------------------------
def _attn_kernel(x_ref, ea_ref, ei_ref, eit_ref, w_ref, b_ref, aggr_ref,
                 *, num_heads, qk_scale, wmap, bmap):
    def W(name):
        r, n, c = wmap[name]
        return w_ref[r:r + n, 0:c]          # static slice view -> bf16 [n, c]

    def B(name):
        r, _, c = bmap[name]
        return b_ref[r:r + 1, 0:c]          # f32 [1, c]

    x = x_ref[...]                          # [N, H] f32
    ea = ea_ref[...]                        # [E, Ce] f32
    N = x.shape[0]
    E = ea.shape[0]

    row_lane = ei_ref[0:1, :]               # [1, E] int32 (destination)
    row_sub = eit_ref[:, 0:1]               # [E, 1] int32
    col_sub = eit_ref[:, 1:2]               # [E, 1] int32

    # One-hot gather/scatter matrices built in-kernel (no [E,N] HBM traffic).
    # TODO(synk): at production N/E replace these one-hot matmuls (O(E*N) VMEM
    # and MXU work) with scalar-prefetched edge_index + true row gathers over an
    # edge-tiled grid accumulating per-node ("arbitrary" axis); a single resident
    # block is strictly faster at these toy shapes.
    iota_en = jax.lax.broadcasted_iota(jnp.int32, (E, N), 1)
    R_bool = iota_en == row_sub
    R = R_bool.astype(F32)                                   # [E, N] dest gather
    C = (iota_en == col_sub).astype(F32)                     # [E, N] src gather
    iota_ne = jax.lax.broadcasted_iota(jnp.int32, (N, E), 0)
    Mm = (iota_ne == row_lane).astype(F32)                   # [N, E] dest scatter

    # Grouped 1x1 convs == block-diagonal matmuls (per-head block dims << 128).
    # TODO(synk): switch to per-head dense matmuls once per-head dims approach 128.
    h_queries = _bdot(x, W('q'))            # [N, K]
    h_keys = _bdot(x, W('k'))               # [N, K]
    h_values = _bdot(x, W('v'))             # [N, H]

    # Edge MLPs; the per-head replication is folded into W('kn2')/W('vn2').
    wk_full = _bdot(_ssp(_bdot(ea, W('kn1')) + B('kn1')), W('kn2')) + B('kn2')   # [E, K]
    wv_full = _bdot(_ssp(_bdot(ea, W('vn1')) + B('vn1')), W('vn2')) + B('vn2')   # [E, H]

    # Gathers via one-hot matmuls (MXU).
    hq_row = _fdot(R, h_queries)            # [E, K]   h_queries[row]
    hk_col = _fdot(C, h_keys)               # [E, K]   h_keys[col]
    hv_col = _fdot(C, h_values)             # [E, H]   h_values[col]

    keys_j = _bdot(wk_full * hk_col, W('klin')) + B('klin')  # [E, K]
    # per-head reduce via exact 0/1 Sk; 1/sqrt(dk) applied as a scalar (exact).
    qk = _bdot(hq_row * keys_j, W('sk')) * qk_scale          # [E, heads]

    # --- scatter-softmax over destination node, per-segment max stabilization ---
    NEG = jnp.float32(-1e30)                # finite: keeps 0*NEG == 0 in matmuls
    shift_cols = []
    for h in range(num_heads):              # heads is tiny and static
        qk_h = qk[:, h:h + 1]                                   # [E, 1]
        scores = jnp.where(R_bool, qk_h, NEG)                   # [E, N]
        node_max_h = jnp.max(scores, axis=0, keepdims=True)     # [1, N]
        # gather the segment max back to edges with a masked lane-sum
        shift_cols.append(jnp.sum(R * node_max_h, axis=1, keepdims=True))  # [E,1]
    edge_shift = jnp.concatenate(shift_cols, axis=1)            # [E, heads]

    ex = jnp.exp(qk - edge_shift)                               # [E, heads]
    node_den = _fdot(Mm, ex)                                    # [N, heads]
    edge_den = _fdot(R, node_den)                               # [E, heads] (>= 1)
    alpha = ex / edge_den                                       # exact divide

    # --- messages + scatter_sum ---
    msg = _bdot(wv_full * hv_col, W('vlin')) + B('vlin')        # [E, H]
    msg = _bdot(alpha, W('av')) * msg                           # per-head broadcast
    aggr_ref[...] = _fdot(Mm, msg)                              # [N, H]


# --------------------------------------------------------------------------
# Kernel 2: node update + position-wise FFN, tiled over node rows
# --------------------------------------------------------------------------
def _node_ffn_kernel(x_ref, aggr_ref, w1_ref, wn_ref, bn_ref, msa_ref, fnn_ref,
                     *, wmap, bmap):
    def W(name):
        r, n, c = wmap[name]
        return wn_ref[r:r + n, 0:c]

    def B(name):
        r, _, c = bmap[name]
        return bn_ref[r:r + 1, 0:c]

    x = x_ref[...]                                   # [tile_n, H] f32
    aggr = aggr_ref[...]                             # [tile_n, H] f32

    out = _bdot(x, W('cen')) + B('cen') + aggr
    out = _bdot(_ssp(out), W('out')) + B('out')
    msa = _layernorm(out, B('ln1w'), B('ln1b'))
    msa_ref[...] = msa

    # position-wise FFN; h1 only ever exists for one node tile.
    h1 = jnp.maximum(_bdot(msa, w1_ref[...]) + B('b1'), 0.0)    # [tile_n, 1024]
    o = _bdot(h1, W('w2')) + B('b2')                            # [tile_n, H]
    fnn_ref[...] = _layernorm(o + msa, B('ln2w'), B('ln2b'))


# --------------------------------------------------------------------------
# Parameter init (deterministic, PyTorch-like uniform fan-in init)
# --------------------------------------------------------------------------
def init_params(key, hidden, edge_ch, key_ch, heads):
    dh = hidden // heads
    dk = key_ch // heads
    dv = hidden // heads
    ks = jax.random.split(key, 20)

    def u(k, shape, fan_in):
        bound = 1.0 / math.sqrt(fan_in)
        return jax.random.uniform(k, shape, F32, -bound, bound)

    p = {}
    p['k_w'] = u(ks[0], (key_ch, dh), dh)     # grouped Conv1d weight (squeezed)
    p['q_w'] = u(ks[1], (key_ch, dh), dh)
    p['v_w'] = u(ks[2], (hidden, dh), dh)
    p['wkn1_w'] = u(ks[3], (dk, edge_ch), edge_ch); p['wkn1_b'] = u(ks[4], (dk,), edge_ch)
    p['wkn2_w'] = u(ks[5], (dk, dk), dk);           p['wkn2_b'] = u(ks[6], (dk,), dk)
    p['wklin_w'] = u(ks[7], (dk, dk), dk);          p['wklin_b'] = u(ks[8], (dk,), dk)
    p['wvn1_w'] = u(ks[9], (dv, edge_ch), edge_ch); p['wvn1_b'] = u(ks[10], (dv,), edge_ch)
    p['wvn2_w'] = u(ks[11], (dv, dv), dv);          p['wvn2_b'] = u(ks[12], (dv,), dv)
    p['wvlin_w'] = u(ks[13], (dv, dv), dv);         p['wvlin_b'] = u(ks[14], (dv,), dv)
    p['cen_w'] = u(ks[15], (hidden, hidden), hidden); p['cen_b'] = u(ks[16], (hidden,), hidden)
    p['out_w'] = u(ks[17], (hidden, hidden), hidden); p['out_b'] = u(ks[18], (hidden,), hidden)
    p['ln1_w'] = jnp.ones((hidden,), F32); p['ln1_b'] = jnp.zeros((hidden,), F32)
    kf = jax.random.split(ks[19], 4)
    p['ffn1_w'] = u(kf[0], (1024, hidden), hidden); p['ffn1_b'] = u(kf[1], (1024,), hidden)
    p['ffn2_w'] = u(kf[2], (hidden, 1024), 1024);   p['ffn2_b'] = u(kf[3], (hidden,), 1024)
    p['ln2_w'] = jnp.ones((hidden,), F32); p['ln2_b'] = jnp.zeros((hidden,), F32)
    return p


def _build_attn_slabs(p, heads, hidden, key_ch):
    dk = key_ch // heads
    dv = hidden // heads

    def bdiag(w, out_per):   # grouped conv -> dense block-diagonal
        return block_diag(*[w[h * out_per:(h + 1) * out_per] for h in range(heads)])

    Sk = jnp.kron(jnp.eye(heads, dtype=F32), jnp.ones((dk, 1), F32))   # [K, heads] 0/1
    Av = jnp.kron(jnp.eye(heads, dtype=F32), jnp.ones((1, dv), F32))   # [heads, H] 0/1

    weights = {
        'q': bdiag(p['q_w'], dk).T,                    # [H, K]
        'k': bdiag(p['k_w'], dk).T,                    # [H, K]
        'v': bdiag(p['v_w'], dv).T,                    # [H, H]
        'kn1': p['wkn1_w'].T,                          # [Ce, dk]
        'kn2': jnp.tile(p['wkn2_w'].T, (1, heads)),    # [dk, K]  (head replication folded in)
        'klin': block_diag(*([p['wklin_w']] * heads)).T,   # [K, K]
        'vn1': p['wvn1_w'].T,                          # [Ce, dv]
        'vn2': jnp.tile(p['wvn2_w'].T, (1, heads)),    # [dv, H]
        'vlin': block_diag(*([p['wvlin_w']] * heads)).T,   # [H, H]
        'sk': Sk,
        'av': Av,
    }
    r2 = lambda v: v.reshape(1, -1)
    biases = {
        'kn1': r2(p['wkn1_b']),
        'kn2': r2(jnp.tile(p['wkn2_b'], heads)),
        'klin': r2(jnp.tile(p['wklin_b'], heads)),
        'vn1': r2(p['wvn1_b']),
        'vn2': r2(jnp.tile(p['wvn2_b'], heads)),
        'vlin': r2(jnp.tile(p['wvlin_b'], heads)),
    }
    wslab, wmap = _pack_rows(weights, BF16, 16)
    bslab, bmap = _pack_rows(biases, F32, 1)
    return wslab, wmap, bslab, bmap


def _build_node_slabs(p):
    weights = {
        'cen': p['cen_w'].T,      # [H, H]
        'out': p['out_w'].T,      # [H, H]
        'w2': p['ffn2_w'].T,      # [1024, H]
    }
    r2 = lambda v: v.reshape(1, -1)
    biases = {
        'cen': r2(p['cen_b']), 'out': r2(p['out_b']),
        'ln1w': r2(p['ln1_w']), 'ln1b': r2(p['ln1_b']),
        'b1': r2(p['ffn1_b']),                  # width 1024
        'b2': r2(p['ffn2_b']),
        'ln2w': r2(p['ln2_w']), 'ln2b': r2(p['ln2_b']),
    }
    w1 = p['ffn1_w'].T.astype(BF16)             # [H, 1024]
    wnslab, wnmap = _pack_rows(weights, BF16, 16)
    bnslab, bnmap = _pack_rows(biases, F32, 1)
    return w1, wnslab, wnmap, bnslab, bnmap


# --------------------------------------------------------------------------
# Wrapper: attention kernel (resident) + node/FFN kernel (node-tiled grid)
# --------------------------------------------------------------------------
def encoder_layer_pallas(p, node_attr, edge_index, edge_attr, *, heads, key_ch):
    N, H = node_attr.shape
    E, Ce = edge_attr.shape
    K = key_ch
    dk, dv = K // heads, H // heads
    dff = p['ffn1_w'].shape[0]
    vmem_limit = _vmem_limit_bytes()

    ei = edge_index.astype(jnp.int32)                 # [2, E]  (lane-oriented row/col)
    eit = ei.T                                        # [E, 2]  (sublane-oriented)

    wslab, wmap, bslab, bmap = _build_attn_slabs(p, heads, H, key_ch)
    attn_inputs = [node_attr, edge_attr, ei, eit, wslab, bslab]

    vmem = lambda: pl.BlockSpec(memory_space=pltpu.MemorySpace.VMEM)

    attn_flops = 2.0 * (N * H * (2 * K + H) + E * Ce * (dk + dv) + E * dk * K
                        + E * dv * H + E * N * (2 * K + H) + E * K * K + E * H * H
                        + E * K * heads + E * heads * H + N * E * (heads + H))
    attn_bytes = int(sum(int(a.size) * a.dtype.itemsize for a in attn_inputs) + N * H * 4)
    attn_cost = pl.CostEstimate(flops=int(attn_flops),
                                transcendentals=int(E * (K + H + heads)),
                                bytes_accessed=attn_bytes)

    aggr = pl.pallas_call(
        functools.partial(_attn_kernel, num_heads=heads,
                          qk_scale=1.0 / math.sqrt(float(dk)),
                          wmap=wmap, bmap=bmap),
        out_shape=jax.ShapeDtypeStruct((N, H), F32),
        in_specs=[vmem() for _ in attn_inputs],
        out_specs=vmem(),
        compiler_params=pltpu.CompilerParams(vmem_limit_bytes=vmem_limit),
        cost_estimate=attn_cost,
    )(*attn_inputs)

    # ---- node update + FFN: real grid over node tiles, parallel for v7x -------
    w1, wnslab, wnmap, bnslab, bnmap = _build_node_slabs(p)
    # 256-row tiles target the 256-wide MXU on v6e/v7x; 128 would suffice on v5e.
    tile_n = N if N <= 256 else 256
    grid = (pl.cdiv(N, tile_n),)

    node_flops = 2.0 * N * (2 * H * H + 2 * H * dff)
    node_bytes = int(2 * N * H * 4 + w1.size * 2 + wnslab.size * 2
                     + bnslab.size * 4 + 2 * N * H * 4)
    node_cost = pl.CostEstimate(flops=int(node_flops),
                                transcendentals=int(N * H),
                                bytes_accessed=node_bytes)

    grid_spec = pltpu.PrefetchScalarGridSpec(
        num_scalar_prefetch=0,
        grid=grid,
        in_specs=[
            pl.BlockSpec((tile_n, H), lambda i: (i, 0)),        # node_attr tile
            pl.BlockSpec((tile_n, H), lambda i: (i, 0)),        # aggr tile
            pl.BlockSpec(w1.shape, lambda i: (0, 0)),           # W1 (resident)
            pl.BlockSpec(wnslab.shape, lambda i: (0, 0)),       # node weight slab
            pl.BlockSpec(bnslab.shape, lambda i: (0, 0)),       # node bias slab
        ],
        out_specs=(pl.BlockSpec((tile_n, H), lambda i: (i, 0)),
                   pl.BlockSpec((tile_n, H), lambda i: (i, 0))),
    )
    msa, fnn = pl.pallas_call(
        functools.partial(_node_ffn_kernel, wmap=wnmap, bmap=bnmap),
        out_shape=(jax.ShapeDtypeStruct((N, H), F32),
                   jax.ShapeDtypeStruct((N, H), F32)),
        grid_spec=grid_spec,
        compiler_params=pltpu.CompilerParams(
            dimension_semantics=("parallel",),
            vmem_limit_bytes=vmem_limit),
        cost_estimate=node_cost,
    )(node_attr, aggr, w1, wnslab, bnslab)
    # TODO(synk): at production widths pad hidden/key channels to multiples of
    # 128 lanes (and the heads lane dim of qk/alpha to >=8) for unmasked stores.
    return msa, fnn


# --------------------------------------------------------------------------
# Pure-JAX reference (mirrors the PyTorch module exactly)
# --------------------------------------------------------------------------
def encoder_layer_ref(p, node_attr, edge_index, edge_attr, *, heads, key_ch):
    N, H = node_attr.shape
    row, col = edge_index[0], edge_index[1]
    dh, dk, dv = H // heads, key_ch // heads, H // heads

    xh = node_attr.reshape(N, heads, dh)
    h_keys = jnp.einsum('nhd,hkd->nhk', xh, p['k_w'].reshape(heads, dk, dh))
    h_queries = jnp.einsum('nhd,hkd->nhk', xh, p['q_w'].reshape(heads, dk, dh))
    h_values = jnp.einsum('nhd,hkd->nhk', xh, p['v_w'].reshape(heads, dv, dh))

    W_k = _ssp(edge_attr @ p['wkn1_w'].T + p['wkn1_b']) @ p['wkn2_w'].T + p['wkn2_b']
    keys_j = (W_k[:, None, :] * h_keys[col]) @ p['wklin_w'].T + p['wklin_b']
    queries_i = h_queries[row]
    qk = (queries_i * keys_j).sum(-1) / math.sqrt(dk)

    mx = jax.ops.segment_max(qk, row, num_segments=N)
    ex = jnp.exp(qk - mx[row])
    den = jax.ops.segment_sum(ex, row, num_segments=N)
    alpha = ex / den[row]

    W_v = _ssp(edge_attr @ p['wvn1_w'].T + p['wvn1_b']) @ p['wvn2_w'].T + p['wvn2_b']
    msg = (W_v[:, None, :] * h_values[col]) @ p['wvlin_w'].T + p['wvlin_b']
    msg = alpha[..., None] * msg
    aggr = jax.ops.segment_sum(msg, row, num_segments=N).reshape(N, H)

    out = node_attr @ p['cen_w'].T + p['cen_b'] + aggr
    out = _ssp(out) @ p['out_w'].T + p['out_b']
    msa = _layernorm(out, p['ln1_w'], p['ln1_b'])

    h1 = jax.nn.relu(msa @ p['ffn1_w'].T + p['ffn1_b'])
    o = h1 @ p['ffn2_w'].T + p['ffn2_b']
    fnn = _layernorm(o + msa, p['ln2_w'], p['ln2_b'])
    return msa, fnn


# --------------------------------------------------------------------------
if __name__ == "__main__":
    N, E = 8, 16
    hidden, edge_ch, key_ch, heads = 32, 16, 32, 4

    root = jax.random.PRNGKey(0)
    k_node, k_edge, k_row, k_col, k_par = jax.random.split(root, 5)
    node_attr = jax.random.normal(k_node, (N, hidden), F32)
    edge_attr = jax.random.normal(k_edge, (E, edge_ch), F32)
    row = jax.random.randint(k_row, (E,), 0, N, jnp.int32)
    col = jax.random.randint(k_col, (E,), 0, N, jnp.int32)
    edge_index = jnp.stack([row, col], axis=0)      # [2, E]

    params = init_params(k_par, hidden, edge_ch, key_ch, heads)

    msa, fnn = encoder_layer_pallas(params, node_attr, edge_index, edge_attr,
                                    heads=heads, key_ch=key_ch)
    jax.block_until_ready((msa, fnn))

    msa_ref, fnn_ref = encoder_layer_ref(params, node_attr, edge_index, edge_attr,
                                         heads=heads, key_ch=key_ch)
    assert msa.shape == (N, hidden) and fnn.shape == (N, hidden)
    # bf16 matmul operands (== default MXU precision for f32 inputs) => relaxed tol
    assert jnp.allclose(msa, msa_ref, rtol=3e-2, atol=3e-2), "MSA mismatch"
    assert jnp.allclose(fnn, fnn_ref, rtol=3e-2, atol=3e-2), "FFN mismatch"
    print("KERNEL_OK")
</pallas_src>

<mosaic_0001>
module attributes {stable_mosaic.version = 11 : i64} {
  func.func @_attn_kernel(%arg0: memref<8x32xf32, #tpu.memory_space<vmem>>, %arg1: memref<16x16xf32, #tpu.memory_space<vmem>>, %arg2: memref<2x16xi32, #tpu.memory_space<vmem>>, %arg3: memref<16x2xi32, #tpu.memory_space<vmem>>, %arg4: memref<272x32xbf16, #tpu.memory_space<vmem>>, %arg5: memref<6x32xf32, #tpu.memory_space<vmem>>, %arg6: memref<8x32xf32, #tpu.memory_space<vmem>>) attributes {dimension_semantics = [], scalar_prefetch = 0 : i64, scratch_operands = 0 : i64, tpu.core_type = #tpu.core_type<tc>} {
    %c0 = arith.constant 0 : index
    %c0_0 = arith.constant 0 : index
    %0 = vector.load %arg0[%c0, %c0_0] : memref<8x32xf32, #tpu.memory_space<vmem>>, vector<8x32xf32>
    %c0_1 = arith.constant 0 : index
    %c0_2 = arith.constant 0 : index
    %1 = vector.load %arg1[%c0_1, %c0_2] : memref<16x16xf32, #tpu.memory_space<vmem>>, vector<16x16xf32>
    %c0_3 = arith.constant 0 : index
    %c0_4 = arith.constant 0 : index
    %2 = vector.load %arg2[%c0_3, %c0_4] : memref<2x16xi32, #tpu.memory_space<vmem>>, vector<1x16xi32>
    %c0_5 = arith.constant 0 : index
    %c0_6 = arith.constant 0 : index
    %3 = vector.load %arg3[%c0_5, %c0_6] : memref<16x2xi32, #tpu.memory_space<vmem>>, vector<16x1xi32>
    %c0_7 = arith.constant 0 : index
    %c1 = arith.constant 1 : index
    %4 = vector.load %arg3[%c0_7, %c1] : memref<16x2xi32, #tpu.memory_space<vmem>>, vector<16x1xi32>
    %5 = tpu.iota {dimensions = array<i32: 1>} : vector<16x8xi32>
    %6 = vector.broadcast %3 : vector<16x1xi32> to vector<16x8xi32>
    %7 = arith.cmpi eq, %5, %6 : vector<16x8xi32>
    %8 = arith.extui %7 : vector<16x8xi1> to vector<16x8xi32>
    %9 = arith.sitofp %8 : vector<16x8xi32> to vector<16x8xf32>
    %10 = vector.broadcast %4 : vector<16x1xi32> to vector<16x8xi32>
    %11 = arith.cmpi eq, %5, %10 : vector<16x8xi32>
    %12 = arith.extui %11 : vector<16x8xi1> to vector<16x8xi32>
    %13 = arith.sitofp %12 : vector<16x8xi32> to vector<16x8xf32>
    %14 = tpu.iota {dimensions = array<i32: 0>} : vector<8x16xi32>
    %15 = vector.broadcast %2 : vector<1x16xi32> to vector<8x16xi32>
    %16 = arith.cmpi eq, %14, %15 : vector<8x16xi32>
    %17 = arith.extui %16 : vector<8x16xi1> to vector<8x16xi32>
    %18 = arith.sitofp %17 : vector<8x16xi32> to vector<8x16xf32>
    %c0_8 = arith.constant 0 : index
    %c0_9 = arith.constant 0 : index
    %19 = vector.load %arg4[%c0_8, %c0_9] : memref<272x32xbf16, #tpu.memory_space<vmem>>, vector<32x32xbf16>
    %20 = arith.truncf %0 : vector<8x32xf32> to vector<8x32xbf16>
    %cst = arith.constant dense<0.000000e+00> : vector<8x32xf32>
    %21 = tpu.matmul %20, %19, %cst {dimension_numbers = #tpu.dot_dimension_numbers<[1], [0], [0], [1], [0, 0, 1, 1], [], []>} : vector<8x32xbf16>, vector<32x32xbf16>, vector<8x32xf32> -> vector<8x32xf32>
    %c32 = arith.constant 32 : index
    %c0_10 = arith.constant 0 : index
    %22 = vector.load %arg4[%c32, %c0_10] : memref<272x32xbf16, #tpu.memory_space<vmem>>, vector<32x32xbf16>
    %23 = arith.truncf %0 : vector<8x32xf32> to vector<8x32xbf16>
    %cst_11 = arith.constant dense<0.000000e+00> : vector<8x32xf32>
    %24 = tpu.matmul %23, %22, %cst_11 {dimension_numbers = #tpu.dot_dimension_numbers<[1], [0], [0], [1], [0, 0, 1, 1], [], []>} : vector<8x32xbf16>, vector<32x32xbf16>, vector<8x32xf32> -> vector<8x32xf32>
    %c64 = arith.constant 64 : index
    %c0_12 = arith.constant 0 : index
    %25 = vector.load %arg4[%c64, %c0_12] : memref<272x32xbf16, #tpu.memory_space<vmem>>, vector<32x32xbf16>
    %26 = arith.truncf %0 : vector<8x32xf32> to vector<8x32xbf16>
    %cst_13 = arith.constant dense<0.000000e+00> : vector<8x32xf32>
    %27 = tpu.matmul %26, %25, %cst_13 {dimension_numbers = #tpu.dot_dimension_numbers<[1], [0], [0], [1], [0, 0, 1, 1], [], []>} : vector<8x32xbf16>, vector<32x32xbf16>, vector<8x32xf32> -> vector<8x32xf32>
    %c96 = arith.constant 96 : index
    %c0_14 = arith.constant 0 : index
    %28 = vector.load %arg4[%c96, %c0_14] : memref<272x32xbf16, #tpu.memory_space<vmem>>, vector<16x8xbf16>
    %29 = arith.truncf %1 : vector<16x16xf32> to vector<16x16xbf16>
    %cst_15 = arith.constant dense<0.000000e+00> : vector<16x8xf32>
    %30 = tpu.matmul %29, %28, %cst_15 {dimension_numbers = #tpu.dot_dimension_numbers<[1], [0], [0], [1], [0, 0, 1, 1], [], []>} : vector<16x16xbf16>, vector<16x8xbf16>, vector<16x8xf32> -> vector<16x8xf32>
    %c0_16 = arith.constant 0 : index
    %c0_17 = arith.constant 0 : index
    %31 = vector.load %arg5[%c0_16, %c0_17] : memref<6x32xf32, #tpu.memory_space<vmem>>, vector<1x8xf32>
    %32 = vector.broadcast %31 : vector<1x8xf32> to vector<16x8xf32>
    %33 = arith.addf %30, %32 : vector<16x8xf32>
    %cst_18 = arith.constant 0.000000e+00 : f32
    %34 = vector.broadcast %cst_18 : f32 to vector<16x8xf32>
    %35 = arith.maximumf %33, %34 : vector<16x8xf32>
    %36 = math.absf %33 : vector<16x8xf32>
    %cst_19 = arith.constant 0.000000e+00 : f32
    %37 = vector.broadcast %cst_19 : f32 to vector<16x8xf32>
    %38 = arith.subf %37, %36 : vector<16x8xf32>
    %39 = math.exp %38 : vector<16x8xf32>
    %40 = math.log1p %39 : vector<16x8xf32>
    %41 = arith.addf %35, %40 : vector<16x8xf32>
    %cst_20 = arith.constant 0.693147182 : f32
    %42 = vector.broadcast %cst_20 : f32 to vector<16x8xf32>
    %43 = arith.subf %41, %42 : vector<16x8xf32>
    %c112 = arith.constant 112 : index
    %c0_21 = arith.constant 0 : index
    %44 = vector.load %arg4[%c112, %c0_21] : memref<272x32xbf16, #tpu.memory_space<vmem>>, vector<8x32xbf16>
    %45 = arith.truncf %43 : vector<16x8xf32> to vector<16x8xbf16>
    %cst_22 = arith.constant dense<0.000000e+00> : vector<16x32xf32>
    %46 = tpu.matmul %45, %44, %cst_22 {dimension_numbers = #tpu.dot_dimension_numbers<[1], [0], [0], [1], [0, 0, 1, 1], [], []>} : vector<16x8xbf16>, vector<8x32xbf16>, vector<16x32xf32> -> vector<16x32xf32>
    %c1_23 = arith.constant 1 : index
    %c0_24 = arith.constant 0 : index
    %47 = vector.load %arg5[%c1_23, %c0_24] : memref<6x32xf32, #tpu.memory_space<vmem>>, vector<1x32xf32>
    %48 = vector.broadcast %47 : vector<1x32xf32> to vector<16x32xf32>
    %49 = arith.addf %46, %48 : vector<16x32xf32>
    %c160 = arith.constant 160 : index
    %c0_25 = arith.constant 0 : index
    %50 = vector.load %arg4[%c160, %c0_25] : memref<272x32xbf16, #tpu.memory_space<vmem>>, vector<16x8xbf16>
    %51 = arith.truncf %1 : vector<16x16xf32> to vector<16x16xbf16>
    %cst_26 = arith.constant dense<0.000000e+00> : vector<16x8xf32>
    %52 = tpu.matmul %51, %50, %cst_26 {dimension_numbers = #tpu.dot_dimension_numbers<[1], [0], [0], [1], [0, 0, 1, 1], [], []>} : vector<16x16xbf16>, vector<16x8xbf16>, vector<16x8xf32> -> vector<16x8xf32>
    %c3 = arith.constant 3 : index
    %c0_27 = arith.constant 0 : index
    %53 = vector.load %arg5[%c3, %c0_27] : memref<6x32xf32, #tpu.memory_space<vmem>>, vector<1x8xf32>
    %54 = vector.broadcast %53 : vector<1x8xf32> to vector<16x8xf32>
    %55 = arith.addf %52, %54 : vector<16x8xf32>
    %cst_28 = arith.constant 0.000000e+00 : f32
    %56 = vector.broadcast %cst_28 : f32 to vector<16x8xf32>
    %57 = arith.maximumf %55, %56 : vector<16x8xf32>
    %58 = math.absf %55 : vector<16x8xf32>
    %cst_29 = arith.constant 0.000000e+00 : f32
    %59 = vector.broadcast %cst_29 : f32 to vector<16x8xf32>
    %60 = arith.subf %59, %58 : vector<16x8xf32>
    %61 = math.exp %60 : vector<16x8xf32>
    %62 = math.log1p %61 : vector<16x8xf32>
    %63 = arith.addf %57, %62 : vector<16x8xf32>
    %cst_30 = arith.constant 0.693147182 : f32
    %64 = vector.broadcast %cst_30 : f32 to vector<16x8xf32>
    %65 = arith.subf %63, %64 : vector<16x8xf32>
    %c176 = arith.constant 176 : index
    %c0_31 = arith.constant 0 : index
    %66 = vector.load %arg4[%c176, %c0_31] : memref<272x32xbf16, #tpu.memory_space<vmem>>, vector<8x32xbf16>
    %67 = arith.truncf %65 : vector<16x8xf32> to vector<16x8xbf16>
    %cst_32 = arith.constant dense<0.000000e+00> : vector<16x32xf32>
    %68 = tpu.matmul %67, %66, %cst_32 {dimension_numbers = #tpu.dot_dimension_numbers<[1], [0], [0], [1], [0, 0, 1, 1], [], []>} : vector<16x8xbf16>, vector<8x32xbf16>, vector<16x32xf32> -> vector<16x32xf32>
    %c4 = arith.constant 4 : index
    %c0_33 = arith.constant 0 : index
    %69 = vector.load %arg5[%c4, %c0_33] : memref<6x32xf32, #tpu.memory_space<vmem>>, vector<1x32xf32>
    %70 = vector.broadcast %69 : vector<1x32xf32> to vector<16x32xf32>
    %71 = arith.addf %68, %70 : vector<16x32xf32>
    %cst_34 = arith.constant dense<0.000000e+00> : vector<16x32xf32>
    %72 = tpu.matmul %9, %21, %cst_34 {dimension_numbers = #tpu.dot_dimension_numbers<[1], [0], [0], [1], [0, 0, 1, 1], [], []>} : vector<16x8xf32>, vector<8x32xf32>, vector<16x32xf32> -> vector<16x32xf32>
    %cst_35 = arith.constant dense<0.000000e+00> : vector<16x32xf32>
    %73 = tpu.matmul %13, %24, %cst_35 {dimension_numbers = #tpu.dot_dimension_numbers<[1], [0], [0], [1], [0, 0, 1, 1], [], []>} : vector<16x8xf32>, vector<8x32xf32>, vector<16x32xf32> -> vector<16x32xf32>
    %cst_36 = arith.constant dense<0.000000e+00> : vector<16x32xf32>
    %74 = tpu.matmul %13, %27, %cst_36 {dimension_numbers = #tpu.dot_dimension_numbers<[1], [0], [0], [1], [0, 0, 1, 1], [], []>} : vector<16x8xf32>, vector<8x32xf32>, vector<16x32xf32> -> vector<16x32xf32>
    %75 = arith.mulf %49, %73 : vector<16x32xf32>
    %c128 = arith.constant 128 : index
    %c0_37 = arith.constant 0 : index
    %76 = vector.load %arg4[%c128, %c0_37] : memref<272x32xbf16, #tpu.memory_space<vmem>>, vector<32x32xbf16>
    %77 = arith.truncf %75 : vector<16x32xf32> to vector<16x32xbf16>
    %cst_38 = arith.constant dense<0.000000e+00> : vector<16x32xf32>
    %78 = tpu.matmul %77, %76, %cst_38 {dimension_numbers = #tpu.dot_dimension_numbers<[1], [0], [0], [1], [0, 0, 1, 1], [], []>} : vector<16x32xbf16>, vector<32x32xbf16>, vector<16x32xf32> -> vector<16x32xf32>
    %c2 = arith.constant 2 : index
    %c0_39 = arith.constant 0 : index
    %79 = vector.load %arg5[%c2, %c0_39] : memref<6x32xf32, #tpu.memory_space<vmem>>, vector<1x32xf32>
    %80 = vector.broadcast %79 : vector<1x32xf32> to vector<16x32xf32>
    %81 = arith.addf %78, %80 : vector<16x32xf32>
    %82 = arith.mulf %72, %81 : vector<16x32xf32>
    %c224 = arith.constant 224 : index
    %c0_40 = arith.constant 0 : index
    %83 = vector.load %arg4[%c224, %c0_40] : memref<272x32xbf16, #tpu.memory_space<vmem>>, vector<32x4xbf16>
    %84 = arith.truncf %82 : vector<16x32xf32> to vector<16x32xbf16>
    %cst_41 = arith.constant dense<0.000000e+00> : vector<16x4xf32>
    %85 = tpu.matmul %84, %83, %cst_41 {dimension_numbers = #tpu.dot_dimension_numbers<[1], [0], [0], [1], [0, 0, 1, 1], [], []>} : vector<16x32xbf16>, vector<32x4xbf16>, vector<16x4xf32> -> vector<16x4xf32>
    %cst_42 = arith.constant 0.353553385 : f32
    %86 = vector.broadcast %cst_42 : f32 to vector<16x4xf32>
    %87 = arith.mulf %85, %86 : vector<16x4xf32>
    %88 = vector.extract_strided_slice %87 {offsets = [0, 0], sizes = [16, 1], strides = [1, 1]} : vector<16x4xf32> to vector<16x1xf32>
    %cst_43 = arith.constant -1.000000e+30 : f32
    %89 = vector.shape_cast %88 : vector<16x1xf32> to vector<16x1xf32>
    %90 = vector.broadcast %89 : vector<16x1xf32> to vector<16x8xf32>
    %91 = vector.broadcast %cst_43 : f32 to vector<16x8xf32>
    %92 = arith.select %7, %90, %91 : vector<16x8xi1>, vector<16x8xf32>
    %cst_44 = arith.constant dense<0xFF800000> : vector<8xf32>
    %93 = vector.multi_reduction <maximumf>, %92, %cst_44 [0] : vector<16x8xf32> to vector<8xf32>
    %94 = vector.shape_cast %93 : vector<8xf32> to vector<1x8xf32>
    %95 = vector.broadcast %94 : vector<1x8xf32> to vector<16x8xf32>
    %96 = arith.mulf %9, %95 : vector<16x8xf32>
    %cst_45 = arith.constant dense<0.000000e+00> : vector<16xf32>
    %97 = vector.multi_reduction <add>, %96, %cst_45 [1] : vector<16x8xf32> to vector<16xf32>
    %98 = vector.shape_cast %97 : vector<16xf32> to vector<16x1xf32>
    %99 = vector.extract_strided_slice %87 {offsets = [0, 1], sizes = [16, 1], strides = [1, 1]} : vector<16x4xf32> to vector<16x1xf32>
    %cst_46 = arith.constant -1.000000e+30 : f32
    %100 = vector.shape_cast %99 : vector<16x1xf32> to vector<16x1xf32>
    %101 = vector.broadcast %100 : vector<16x1xf32> to vector<16x8xf32>
    %102 = vector.broadcast %cst_46 : f32 to vector<16x8xf32>
    %103 = arith.select %7, %101, %102 : vector<16x8xi1>, vector<16x8xf32>
    %cst_47 = arith.constant dense<0xFF800000> : vector<8xf32>
    %104 = vector.multi_reduction <maximumf>, %103, %cst_47 [0] : vector<16x8xf32> to vector<8xf32>
    %105 = vector.shape_cast %104 : vector<8xf32> to vector<1x8xf32>
    %106 = vector.broadcast %105 : vector<1x8xf32> to vector<16x8xf32>
    %107 = arith.mulf %9, %106 : vector<16x8xf32>
    %cst_48 = arith.constant dense<0.000000e+00> : vector<16xf32>
    %108 = vector.multi_reduction <add>, %107, %cst_48 [1] : vector<16x8xf32> to vector<16xf32>
    %109 = vector.shape_cast %108 : vector<16xf32> to vector<16x1xf32>
    %110 = vector.extract_strided_slice %87 {offsets = [0, 2], sizes = [16, 1], strides = [1, 1]} : vector<16x4xf32> to vector<16x1xf32>
    %cst_49 = arith.constant -1.000000e+30 : f32
    %111 = vector.shape_cast %110 : vector<16x1xf32> to vector<16x1xf32>
    %112 = vector.broadcast %111 : vector<16x1xf32> to vector<16x8xf32>
    %113 = vector.broadcast %cst_49 : f32 to vector<16x8xf32>
    %114 = arith.select %7, %112, %113 : vector<16x8xi1>, vector<16x8xf32>
    %cst_50 = arith.constant dense<0xFF800000> : vector<8xf32>
    %115 = vector.multi_reduction <maximumf>, %114, %cst_50 [0] : vector<16x8xf32> to vector<8xf32>
    %116 = vector.shape_cast %115 : vector<8xf32> to vector<1x8xf32>
    %117 = vector.broadcast %116 : vector<1x8xf32> to vector<16x8xf32>
    %118 = arith.mulf %9, %117 : vector<16x8xf32>
    %cst_51 = arith.constant dense<0.000000e+00> : vector<16xf32>
    %119 = vector.multi_reduction <add>, %118, %cst_51 [1] : vector<16x8xf32> to vector<16xf32>
    %120 = vector.shape_cast %119 : vector<16xf32> to vector<16x1xf32>
    %121 = vector.extract_strided_slice %87 {offsets = [0, 3], sizes = [16, 1], strides = [1, 1]} : vector<16x4xf32> to vector<16x1xf32>
    %cst_52 = arith.constant -1.000000e+30 : f32
    %122 = vector.shape_cast %121 : vector<16x1xf32> to vector<16x1xf32>
    %123 = vector.broadcast %122 : vector<16x1xf32> to vector<16x8xf32>
    %124 = vector.broadcast %cst_52 : f32 to vector<16x8xf32>
    %125 = arith.select %7, %123, %124 : vector<16x8xi1>, vector<16x8xf32>
    %cst_53 = arith.constant dense<0xFF800000> : vector<8xf32>
    %126 = vector.multi_reduction <maximumf>, %125, %cst_53 [0] : vector<16x8xf32> to vector<8xf32>
    %127 = vector.shape_cast %126 : vector<8xf32> to vector<1x8xf32>
    %128 = vector.broadcast %127 : vector<1x8xf32> to vector<16x8xf32>
    %129 = arith.mulf %9, %128 : vector<16x8xf32>
    %cst_54 = arith.constant dense<0.000000e+00> : vector<16xf32>
    %130 = vector.multi_reduction <add>, %129, %cst_54 [1] : vector<16x8xf32> to vector<16xf32>
    %131 = vector.shape_cast %130 : vector<16xf32> to vector<16x1xf32>
    %132 = tpu.concatenate %98, %109, %120, %131 in 1 : vector<16x1xf32>, vector<16x1xf32>, vector<16x1xf32>, vector<16x1xf32> -> vector<16x4xf32>
    %133 = arith.subf %87, %132 : vector<16x4xf32>
    %134 = math.exp %133 : vector<16x4xf32>
    %cst_55 = arith.constant dense<0.000000e+00> : vector<8x4xf32>
    %135 = tpu.matmul %18, %134, %cst_55 {dimension_numbers = #tpu.dot_dimension_numbers<[1], [0], [0], [1], [0, 0, 1, 1], [], []>} : vector<8x16xf32>, vector<16x4xf32>, vector<8x4xf32> -> vector<8x4xf32>
    %cst_56 = arith.constant dense<0.000000e+00> : vector<16x4xf32>
    %136 = tpu.matmul %9, %135, %cst_56 {dimension_numbers = #tpu.dot_dimension_numbers<[1], [0], [0], [1], [0, 0, 1, 1], [], []>} : vector<16x8xf32>, vector<8x4xf32>, vector<16x4xf32> -> vector<16x4xf32>
    %137 = arith.divf %134, %136 : vector<16x4xf32>
    %138 = arith.mulf %71, %74 : vector<16x32xf32>
    %c192 = arith.constant 192 : index
    %c0_57 = arith.constant 0 : index
    %139 = vector.load %arg4[%c192, %c0_57] : memref<272x32xbf16, #tpu.memory_space<vmem>>, vector<32x32xbf16>
    %140 = arith.truncf %138 : vector<16x32xf32> to vector<16x32xbf16>
    %cst_58 = arith.constant dense<0.000000e+00> : vector<16x32xf32>
    %141 = tpu.matmul %140, %139, %cst_58 {dimension_numbers = #tpu.dot_dimension_numbers<[1], [0], [0], [1], [0, 0, 1, 1], [], []>} : vector<16x32xbf16>, vector<32x32xbf16>, vector<16x32xf32> -> vector<16x32xf32>
    %c5 = arith.constant 5 : index
    %c0_59 = arith.constant 0 : index
    %142 = vector.load %arg5[%c5, %c0_59] : memref<6x32xf32, #tpu.memory_space<vmem>>, vector<1x32xf32>
    %143 = vector.broadcast %142 : vector<1x32xf32> to vector<16x32xf32>
    %144 = arith.addf %141, %143 : vector<16x32xf32>
    %c256 = arith.constant 256 : index
    %c0_60 = arith.constant 0 : index
    %145 = vector.load %arg4[%c256, %c0_60] : memref<272x32xbf16, #tpu.memory_space<vmem>>, vector<4x32xbf16>
    %146 = arith.truncf %137 : vector<16x4xf32> to vector<16x4xbf16>
    %cst_61 = arith.constant dense<0.000000e+00> : vector<16x32xf32>
    %147 = tpu.matmul %146, %145, %cst_61 {dimension_numbers = #tpu.dot_dimension_numbers<[1], [0], [0], [1], [0, 0, 1, 1], [], []>} : vector<16x4xbf16>, vector<4x32xbf16>, vector<16x32xf32> -> vector<16x32xf32>
    %148 = arith.mulf %147, %144 : vector<16x32xf32>
    %cst_62 = arith.constant dense<0.000000e+00> : vector<8x32xf32>
    %149 = tpu.matmul %18, %148, %cst_62 {dimension_numbers = #tpu.dot_dimension_numbers<[1], [0], [0], [1], [0, 0, 1, 1], [], []>} : vector<8x16xf32>, vector<16x32xf32>, vector<8x32xf32> -> vector<8x32xf32>
    %c0_63 = arith.constant 0 : index
    %c0_64 = arith.constant 0 : index
    %150 = vector.load %arg6[%c0_63, %c0_64] : memref<8x32xf32, #tpu.memory_space<vmem>>, vector<8x32xf32>
    tpu.vector_store %arg6[%c0_63, %c0_64], %149 {strides = array<i32>} : memref<8x32xf32, #tpu.memory_space<vmem>>, vector<8x32xf32>,
    return
  }
}

</mosaic_0001>

<bundles_post_ra>
// kernel: tpu_custom_call.1
= control target key start
LH: loop header
LB: loop body
LE: loop exit
PB: predicated region body
PF: predicated region fallthrough
CT: control target
= control target key end

     0   :  { %11 = vsyncpa [#allocation3], 0  ;;  %s2221_s0 = inlined_call_operand.hbm [shape: f32[8,32], index: 0, kind: input, shape index: {}]   ;;  %s2222_s1 = inlined_call_operand.hbm [shape: f32[16,16], index: 1, kind: input, shape index: {}]   ;;  %s2223_s2 = inlined_call_operand.hbm [shape: s32[2,16], index: 2, kind: input, shape index: {}]   ;;  %s2224_s3 = inlined_call_operand.hbm [shape: s32[16,2], index: 3, kind: input, shape index: {}]   ;;  %s2225_s4 = inlined_call_operand.hbm [shape: bf16[272,32], index: 4, kind: input, shape index: {}]   ;;  %s2226_s5 = inlined_call_operand.hbm [shape: f32[6,32], index: 5, kind: input, shape index: {}]   ;;  %s2227_s6 = inlined_call_operand.hbm [shape: f32[8,32], index: 6, kind: output, shape index: {}]  }
   0x1   :  { %12 = vsyncpa [#allocation6], 0 }
   0x2   :  { %13 = vsyncpa [#allocation9], 0 }
   0x3   :  { %14 = vsyncpa [#allocation12], 0 }
   0x4   :  { %15 = vsyncpa [#allocation4], 0  ;;  %s1903_s21 = smov [#allocation5]   ;;  %s1739_s25 = scalar_lea.hbm %s2222_s1, 256 }
   0x5   :  { %s31_s22 = sshll.u32 %s1903_s21, 4  ;;  %p1740_p0 = scmp.ne.s32.totalorder %s2222_s1, %s1739_s25  ;;  %s32_s22 = int_to_ptr.vmem [resolvable:$true] %s31_s22 }
   0x6   :  { %p1743_p1 = scmp.lt.u32.totalorder %s1739_s25, %s2222_s1 }
   0x8   :  { %p1745_p2 = pnand %p1743_p1, %p1740_p0 }
   0xa   :  { %1748 = shalt.err (!%p1745_p2)
}
   0xb   :  { %s1749_s30 = scalar_lea.vmem %s32_s22, 256  ;;  %p1754_p4 = scmp.lt.s32.totalorder %s32_s22, %s32_s22 }
   0xc   :  { %p1750_p3 = scmp.ne.s32.totalorder %s32_s22, %s1749_s30  ;;  %p1755_p5 = scmp.lt.s32.totalorder %s1749_s30, %s1749_s30 }
   0xe   :  { %p1756_p6 = por %p1755_p5, %p1754_p4 }
  0x10   :  { %p1757_p7 = pnand %p1756_p6, %p1750_p3 }
  0x12   :  { %1760 = shalt.err (!%p1757_p7)
}
  0x13   :  { %s1904_s7 = smov 128   ;;  %s1905_s8 = smov 8  }
  0x14   :  { %37 = dma.hbm_to_vmem [thread:$0]  %s2222_s1, 256, %s32_s22, [#allocation6], %s1904_s7, %s1904_s7, %s1905_s8  }
  0x15   :  { %s1906_s11 = smov [#allocation8]   ;;  %s1907_s13 = smov [#allocation2]  }
  0x16   :  { %s53_s12 = sshll.u32 %s1906_s11, 4  ;;  %s22_s14 = sshll.u32 %s1907_s13, 4  ;;  %s54_s12 = int_to_ptr.vmem [resolvable:$true] %s53_s12  ;;  %s23_s14 = int_to_ptr.vmem [resolvable:$true] %s22_s14 }
  0x17   :  { %s1761_s17 = scalar_lea.hbm %s2224_s3, 256 }
  0x18   :  { %p1762_p8 = scmp.ne.s32.totalorder %s2224_s3, %s1761_s17  ;;  %p1765_p9 = scmp.lt.u32.totalorder %s1761_s17, %s2224_s3 }
  0x1a   :  { %p1767_p10 = pnand %p1765_p9, %p1762_p8 }
  0x1c   :  { %1770 = shalt.err (!%p1767_p10)
}
  0x1d   :  { %s1771_s1 = scalar_lea.vmem %s54_s12, 256  ;;  %p1776_p12 = scmp.lt.s32.totalorder %s54_s12, %s54_s12 }
  0x1e   :  { %p1772_p11 = scmp.ne.s32.totalorder %s54_s12, %s1771_s1  ;;  %p1777_p13 = scmp.lt.s32.totalorder %s1771_s1, %s1771_s1 }
  0x20   :  { %p1778_p0 = por %p1777_p13, %p1776_p12 }
  0x22   :  { %p1779_p1 = pnand %p1778_p0, %p1772_p11 }
  0x24   :  { %1782 = shalt.err (!%p1779_p1)
}
  0x25   :  { %59 = dma.hbm_to_vmem [thread:$0]  %s2224_s3, 256, %s54_s12, [#allocation9], %s1904_s7, %s1904_s7, %s1905_s8  }
  0x26   :  { %s1783_s26 = scalar_lea.hbm %s2221_s0, 128 }
  0x27   :  { %p1784_p2 = scmp.ne.s32.totalorder %s2221_s0, %s1783_s26  ;;  %p1787_p3 = scmp.lt.u32.totalorder %s1783_s26, %s2221_s0 }
  0x29   :  { %p1789_p4 = pnand %p1787_p3, %p1784_p2 }
  0x2b   :  { %1792 = shalt.err (!%p1789_p4)
}
  0x2c   :  { %s1793_s9 = scalar_lea.vmem %s23_s14, 128  ;;  %p1798_p6 = scmp.lt.s32.totalorder %s23_s14, %s23_s14 }
  0x2d   :  { %p1794_p5 = scmp.ne.s32.totalorder %s23_s14, %s1793_s9  ;;  %p1799_p7 = scmp.lt.s32.totalorder %s1793_s9, %s1793_s9 }
  0x2f   :  { %p1800_p8 = por %p1799_p7, %p1798_p6 }
  0x31   :  { %p1801_p9 = pnand %p1800_p8, %p1794_p5 }
  0x33   :  { %1804 = shalt.err (!%p1801_p9)
}
  0x34   :  { %25 = dma.hbm_to_vmem [thread:$0]  %s2221_s0, 128, %s23_s14, [#allocation3]  }
  0x35   :  { %s1908_s8 = smov [#allocation7]   ;;  %s1909_s11 = smov [#allocation10]  }
  0x36   :  { %s44_s10 = sshll.u32 %s1908_s8, 4  ;;  %s65_s12 = sshll.u32 %s1909_s11, 4  ;;  %s45_s10 = int_to_ptr.vmem [resolvable:$true] %s44_s10  ;;  %s66_s12 = int_to_ptr.vmem [resolvable:$true] %s65_s12 }
  0x37   :  { %s1805_s16 = scalar_lea.hbm %s2223_s2, 32 }
  0x38   :  { %p1806_p10 = scmp.ne.s32.totalorder %s2223_s2, %s1805_s16  ;;  %p1809_p11 = scmp.lt.u32.totalorder %s1805_s16, %s2223_s2 }
  0x3a   :  { %p1811_p12 = pnand %p1809_p11, %p1806_p10 }
  0x3c   :  { %1814 = shalt.err (!%p1811_p12)
}
  0x3d   :  { %s1815_s0 = scalar_lea.vmem %s45_s10, 32  ;;  %p1820_p0 = scmp.lt.s32.totalorder %s45_s10, %s45_s10 }
  0x3e   :  { %p1816_p13 = scmp.ne.s32.totalorder %s45_s10, %s1815_s0  ;;  %p1821_p1 = scmp.lt.s32.totalorder %s1815_s0, %s1815_s0 }
  0x40   :  { %p1822_p2 = por %p1821_p1, %p1820_p0 }
  0x42   :  { %p1823_p3 = pnand %p1822_p2, %p1816_p13 }
  0x44   :  { %1826 = shalt.err (!%p1823_p3)
}
  0x45   :  { %47 = dma.hbm_to_vmem [thread:$0]  %s2223_s2, 32, %s45_s10, [#allocation6]  }
  0x46   :  { %s1827_s23 = scalar_lea.hbm %s2225_s4, 2176 }
  0x47   :  { %p1828_p4 = scmp.ne.s32.totalorder %s2225_s4, %s1827_s23  ;;  %p1831_p5 = scmp.lt.u32.totalorder %s1827_s23, %s2225_s4 }
  0x49   :  { %p1833_p6 = pnand %p1831_p5, %p1828_p4 }
  0x4b   :  { %1836 = shalt.err (!%p1833_p6)
}
  0x4c   :  { %s1837_s28 = scalar_lea.vmem %s66_s12, 2176  ;;  %p1842_p8 = scmp.lt.s32.totalorder %s66_s12, %s66_s12 }
  0x4d   :  { %p1838_p7 = scmp.ne.s32.totalorder %s66_s12, %s1837_s28  ;;  %p1843_p9 = scmp.lt.s32.totalorder %s1837_s28, %s1837_s28 }
  0x4f   :  { %p1844_p10 = por %p1843_p9, %p1842_p8 }
  0x51   :  { %p1845_p11 = pnand %p1844_p10, %p1838_p7 }
  0x53   :  { %1848 = shalt.err (!%p1845_p11)
}
  0x54   :  { %s1910_s2 = smov 64   ;;  %s1911_s29 = smov 4  }
  0x55   :  { %71 = dma.hbm_to_vmem [thread:$0]  %s2225_s4, 2176, %s66_s12, [#allocation9], %s1910_s2, %s1910_s2, %s1911_s29  }
  0x56   :  { %s1912_s3 = smov [#allocation11]   ;;  %s1849_s11 = scalar_lea.hbm %s2226_s5, 128 }
  0x57   :  { %s78_s7 = sshll.u32 %s1912_s3, 4  ;;  %p1850_p12 = scmp.ne.s32.totalorder %s2226_s5, %s1849_s11  ;;  %s79_s7 = int_to_ptr.vmem [resolvable:$true] %s78_s7 }
  0x58   :  { %p1853_p13 = scmp.lt.u32.totalorder %s1849_s11, %s2226_s5 }
  0x5a   :  { %p1855_p0 = pnand %p1853_p13, %p1850_p12 }
  0x5c   :  { %1858 = shalt.err (!%p1855_p0)
}
  0x5d   :  { %s1859_s18 = scalar_lea.vmem %s79_s7, 128  ;;  %p1864_p2 = scmp.lt.s32.totalorder %s79_s7, %s79_s7 }
  0x5e   :  { %p1860_p1 = scmp.ne.s32.totalorder %s79_s7, %s1859_s18  ;;  %p1865_p3 = scmp.lt.s32.totalorder %s1859_s18, %s1859_s18 }
  0x60   :  { %p1866_p4 = por %p1865_p3, %p1864_p2 }
  0x62   :  { %p1867_p5 = pnand %p1866_p4, %p1860_p1 }
  0x64   :  { %1870 = shalt.err (!%p1867_p5)
}
  0x65   :  { %81 = dma.hbm_to_vmem [thread:$0]  %s2226_s5, 128, %s79_s7, [#allocation12]  }
  0x66   :  { %1893 = dma.done.wait [#allocation3], 128  }
  0x67   :  { %1894 = vsyncadd [#allocation3], 4294967168 }
  0x68   :  { %1895 = dma.done.wait [#allocation6], 288  }
  0x69   :  { %1896 = vsyncadd [#allocation6], 4294967008 }
  0x6a   :  { %1897 = dma.done.wait [#allocation9], 2432  }
  0x6b   :  { %1898 = vsyncadd [#allocation9], 4294964864 }
  0x6c   :  { %1899 = dma.done.wait [#allocation12], 128  }
  0x6d   :  { %1900 = vsyncadd [#allocation12], 4294967168  ;;  %v1913_v0 = vmov 0.0   ;;  %vm1914_vm0 = vmmov 0   ;;  %v1915_v1 = vmov 0   ;;  %v1916_v2 = vmov 1  }
  0x6e   :  { %1556 = vmatprep.subr.bf16.mxu0 %v1913_v0  ;;  %1564 = vmatprep.subr.bf16.mxu1 %v1913_v0  ;;  %v1701_v3 = vld [vmem:[#allocation10] sm:$0xff]   ;;  %v1702_v4 = vld [vmem:[#allocation10 + $0x10] sm:$0xff]   ;;  %v1703_v5 = vld [vmem:[#allocation10 + $0x8] sm:$0xff]   ;;  %vm159_vm1 = vcmask 261120   ;;  %vm329_vm2 = vcmask 130048   ;;  %v107_v18 = vlaneseq  ;;  %vm413_vm3 = vcmask 64512  }
  0x6f   :  { %1560 = vmatprep.mubr.msk.bf16.mxu0 %vm1914_vm0, %v1913_v0  ;;  %1568 = vmatprep.mubr.msk.bf16.mxu1 %vm1914_vm0, %v1913_v0  ;;  %v1704_v6 = vld [vmem:[#allocation10 + $0x18] sm:$0xff]   ;;  %v1705_v9 = vld [vmem:[#allocation10 + $0x30] sm:$0xff]   ;;  %v1707_v10 = vld [vmem:[#allocation10 + $0x20] sm:$0xff]   ;;  %vm417_vm5 = vcmask 1043456   ;;  %vm1082_vm13 = vcmask 7168   ;;  %vm1085_vm14 = vcmask 15360  }
  0x70   :  { %1692 = vset.pattern.permute.xlu0 %v1915_v1  ;;  %1693 = vset.pattern.permute.xlu1 %v1916_v2  ;;  %v101_v7 = vld [vmem:[#allocation2] sm:$0xff]  ;;  %v102_v11 = vld [vmem:[#allocation5] sm:$0xff]  ;;  %v103_v12 = vld [vmem:[#allocation5 + $0x8] sm:$0xff]  ;;  %v108_v19 = vand.u32 127, %v107_v18  ;;  %vm1088_vm15 = vcmask 23552   ;;  %s1920_s5 = smov [#allocation13]  }
  0x71   :  { %1557 = vmatpush3.bf16.msra.mxu0 %v1701_v3  ;;  %1565 = vmatpush3.bf16.msra.mxu1 %v1702_v4  ;;  %v146_v8 = vpack.c.bf16 %v101_v7, %v101_v7  ;;  %v1708_v13 = vld [vmem:[#allocation10 + $0x28] sm:$0xff]   ;;  %v105_v14 = vld [vmem:[#allocation8] sm:$0xff]  ;;  %v317_v15 = vpack.c.bf16 %v103_v12, %v102_v11  ;;  %v106_v16 = vld [vmem:[#allocation8 + $0x8] sm:$0xff]  ;;  %s1447_s19 = sshll.u32 %s1920_s5, 4  ;;  %s1448_s19 = int_to_ptr.vmem [resolvable:$true] %s1447_s19 }
  0x72   :  { %1558 = vmatprep.subr.bf16.mxu0 %v1913_v0  ;;  %1566 = vmatprep.subr.bf16.mxu1 %v1913_v0  ;;  %v1706_v17 = vld [vmem:[#allocation10 + $0x50] sm:$0xff]   ;;  %v406_v22 = vld [vmem:[#allocation10 + $0x38] sm:$0xf]  ;;  %v1474_v40 = vld [vmem:[#allocation11] ss:$0 sm:$0xff]  ;;  %s1871_s20 = scalar_lea.vmem %s1448_s19, 128  ;;  %p1876_p7 = scmp.lt.s32.totalorder %s1448_s19, %s1448_s19 }
  0x73   :  { %110 = vperm.xlu0 %1692, %v105_v14   ;;  %122 = vperm.xlu1 %1693, %v105_v14   ;;  %v419_v24 = vsel %vm417_vm5, %v406_v22, 0  ;;  %v1481_v54 = vld [vmem:[#allocation11 + $0x3] ss:$0 sm:$0xff]  ;;  %p1872_p6 = scmp.ne.s32.totalorder %s1448_s19, %s1871_s20  ;;  %p1877_p8 = scmp.lt.s32.totalorder %s1871_s20, %s1871_s20 }
  0x75   :  { %1559 = vmatpush3.bf16.msra.mxu0 %v1703_v5  ;;  %1567 = vmatpush3.bf16.msra.mxu1 %v1704_v6  ;;  %p1878_p9 = por %p1877_p8, %p1876_p7 }
  0x76   :  { %1572 = vmatprep.subr.bf16.mxu0 %v1913_v0  ;;  %1580 = vmatprep.subr.bf16.mxu1 %v1913_v0 }
  0x77   :  { %113 = vperm.xlu0 %1692, %v106_v16   ;;  %125 = vperm.xlu1 %1693, %v106_v16   ;;  %p1879_p10 = pnand %p1878_p9, %p1872_p6 }
  0x78   :  { %1561 = vmatmul.mubr.msk.bf16.vlgmr.msra.gmra.mrb[0].mxu0 %vm159_vm1, %v146_v8  ;;  %1569 = vmatmul.mubr.msk.bf16.vlgmr.msra.gmra.mrb[0].mxu1 %vm159_vm1, %v146_v8 }
  0x79   :  { %1573 = vmatpush3.bf16.msra.mxu0 %v1707_v10  ;;  %1581 = vmatpush3.bf16.msra.mxu1 %v1705_v9 }
  0x7a   :  { %1582 = vmatprep.mubr.msk.bf16.mxu1 %vm1914_vm0, %v1913_v0  ;;  %1592 = vmatprep.subr.bf16.mxu1 %v1913_v0 }
  0x7b   :  { %1574 = vmatprep.subr.bf16.mxu0 %v1913_v0  ;;  %1576 = vmatprep.mubr.msk.bf16.mxu0 %vm1914_vm0, %v1913_v0 }
  0x7d   :  { %1575 = vmatpush3.bf16.msra.mxu0 %v1708_v13 }
  0x7e   :  { %1586 = vmatprep.subr.bf16.mxu0 %v1913_v0 }
  0x80   :  { %1577 = vmatmul.mubr.msk.bf16.vlgmr.msra.gmra.mrb[4].mxu0 %vm159_vm1, %v146_v8  ;;  %1583 = vmatmul.mubr.msk.bf16.vlgmr.msra.gmra.mrb[4].mxu1 %vm329_vm2, %v317_v15 }
  0x81   :  { %1593 = vmatpush3.bf16.msra.mxu1 %v1706_v17  ;;  %1594 = vmatprep.mubr.msk.bf16.mxu1 %vm1914_vm0, %v1913_v0 }
  0x82   :  { %1588 = vmatprep.mubr.msk.bf16.mxu0 %vm1914_vm0, %v1913_v0  ;;  %1587 = vmatpush3.bf16.msra.mxu0 %v419_v24 }
  0x83   :  { %1598 = vmatprep.subr.bf16.mxu0 %v1913_v0 }
  0x88   :  { %1595 = vmatmul.mubr.msk.bf16.vlgmr.msra.gmra.mrb[8].mxu1 %vm329_vm2, %v317_v15 }
  0xf2   :  { %v111_v20 = vpop.permute.xlu0 %110  ;;  %v123_v25 = vpop.permute.xlu1 %122 }
  0xf3   :  { %vm2057_vm4 = vcmp.eq.s32.totalorder %v108_v19, %v111_v20  ;;  %vm127_vm7 = vcmp.eq.s32.totalorder %v108_v19, %v123_v25 }
  0xf4   :  { %v2064_v23 = vsel %vm2057_vm4, 1.0, %v1913_v0  ;;  %v2080_v32 = vsel %vm127_vm7, 1.0, %v1913_v0 }
  0xf5   :  { %1606 = vmatprep.mubr.msk.f32.mxu1 %vm413_vm3, %v2064_v23 }
  0xf6   :  { %v114_v26 = vpop.permute.xlu0 %113  ;;  %v126_v28 = vpop.permute.xlu1 %125 }
  0xf7   :  { %vm2070_vm6 = vcmp.eq.s32.totalorder %v108_v19, %v114_v26  ;;  %vm128_vm8 = vcmp.eq.s32.totalorder %v108_v19, %v126_v28 }
  0xf8   :  { %v2077_v30 = vsel %vm2070_vm6, 1.0, %v1913_v0  ;;  %v2085_v39 = vsel %vm128_vm8, 1.0, %v1913_v0 }
 0x14b   :  { %v197_v29 = vpop.f32.mrb[0].mxu0  ;;  %v253_v31 = vpop.f32.mrb[0].mxu1 }
 0x14c   :  { %1604 = vmatprep.subr.mxu1 %v197_v29  ;;  %v1562_v33 = vpop.f32.mrb[1].mxu0  ;;  %v1570_v34 = vpop.f32.mrb[1].mxu1 }
 0x14d   :  { %1605 = vmatpush3.msra.mxu1 %v197_v29  ;;  %v200_v35 = vpop.f32.mrb[2].mxu0  ;;  %v256_v36 = vpop.f32.mrb[2].mxu1 }
 0x14e   :  { %1609 = vmatprep.subr.mxu1 %v253_v31  ;;  %1607 = vmatmul.mubr.msk.f32.vlgmr.msra.gmra.mrb[12].mxu1 %vm413_vm3, %v2077_v30  ;;  %v1563_v37 = vpop.f32.mrb[3].mxu0  ;;  %v1571_v38 = vpop.f32.mrb[3].mxu1 }
 0x14f   :  { %1610 = vmatpush3.msra.mxu1 %v253_v31  ;;  %1611 = vmatprep.mubr.msk.f32.mxu1 %vm413_vm3, %v2080_v32 }
 0x150   :  { %1619 = vmatprep.subr.bf16.mxu1 %v1913_v0 }
 0x152   :  { %1612 = vmatmul.mubr.msk.f32.vlgmr.msra.gmra.mrb[14].mxu1 %vm413_vm3, %v2085_v39 }
 0x153   :  { %v2092_v41 = vpop.f32.mrb[4].mxu0  ;;  %1623 = vmatprep.mubr.msk.bf16.mxu1 %vm1914_vm0, %v1913_v0  ;;  %v367_v42 = vpop.f32.mrb[4].mxu1 }
 0x154   :  { %v1578_v43 = vpop.f32.mrb[5].mxu0  ;;  %v368_v44 = vadd.f32 %v1474_v40, %v367_v42  ;;  %v1584_v45 = vpop.f32.mrb[5].mxu1 }
 0x155   :  { %v312_v46 = vpop.f32.mrb[6].mxu0  ;;  %v370_v47 = vpop.f32.mrb[6].mxu1 }
 0x156   :  { %v1579_v48 = vpop.f32.mrb[7].mxu0  ;;  %v376_v49 = vand.u32 2147483647, %v368_v44  ;;  %v371_v50 = vadd.f32 %v1474_v40, %v370_v47  ;;  %v1585_v51 = vpop.f32.mrb[7].mxu1  ;;  %v374_v35 = vmax.f32 %v368_v44, 0.0 }
 0x158   :  { %v378_v52 = vsub.f32 0.0, %v376_v49  ;;  %v377_v53 = vand.u32 2147483647, %v371_v50  ;;  %v375_v43 = vmax.f32 %v371_v50, 0.0 }
 0x15a   :  { %v380_v55 = vmul.f32 1.442695, %v378_v52  ;;  %v379_v56 = vsub.f32 0.0, %v377_v53  ;;  %v548_v53 = vld [vmem:[#allocation10 + $0x58] sm:$0xf] }
 0x15b   :  { %v509_v57 = vpop.f32.mrb[8].mxu1 }
 0x15c   :  { %1715 = vpow2.f32 %v380_v55  ;;  %v382_v58 = vmul.f32 1.442695, %v379_v56  ;;  %v2096_v59 = vadd.f32 %v1481_v54, %v509_v57  ;;  %v1596_v60 = vpop.f32.mrb[9].mxu1 }
 0x15d   :  { %v512_v61 = vpop.f32.mrb[10].mxu1 }
 0x15e   :  { %1717 = vpow2.f32 %v382_v58  ;;  %v518_v62 = vand.u32 2147483647, %v2096_v59  ;;  %v2099_v63 = vadd.f32 %v1481_v54, %v512_v61  ;;  %v1597_v3 = vpop.f32.mrb[11].mxu1  ;;  %v516_v51 = vmax.f32 %v2096_v59, 0.0 }
 0x15f   :  { %v559_v61 = vsel %vm417_vm5, %v548_v53, 0  ;;  %vm1323_vm5 = vcmask 1041408  }
 0x160   :  { %v520_v4 = vsub.f32 0.0, %v518_v62  ;;  %v519_v5 = vand.u32 2147483647, %v2099_v63  ;;  %v517_v50 = vmax.f32 %v2099_v63, 0.0  ;;  %v1709_v63 = vld [vmem:[#allocation10 + $0x40] sm:$0xff]  }
 0x161   :  { %1620 = vmatpush3.bf16.msra.mxu1 %v1709_v63 }
 0x162   :  { %v522_v6 = vmul.f32 1.442695, %v520_v4  ;;  %v521_v7 = vsub.f32 0.0, %v519_v5  ;;  %1621 = vmatprep.subr.bf16.mxu1 %v1913_v0 }
 0x164   :  { %1719 = vpow2.f32 %v522_v6  ;;  %v524_v8 = vmul.f32 1.442695, %v521_v7 }
 0x166   :  { %v1716_v9 = vpop.eup %1715  ;;  %1721 = vpow2.f32 %v524_v8 }
 0x167   :  { %v384_v10 = vadd.f32 1.0, %v1716_v9  ;;  %v387_v13 = vmul.f32 -0.5, %v1716_v9  ;;  %v390_v20 = vand.u32 2147483647, %v1716_v9 }
 0x168   :  { %v1718_v11 = vpop.eup %1717 }
 0x169   :  { %1723 = vlog2.f32 %v384_v10  ;;  %v393_v12 = vadd.f32 1.0, %v1718_v11  ;;  %v396_v15 = vmul.f32 -0.5, %v1718_v11  ;;  %v388_v19 = vadd.f32 1.0, %v387_v13  ;;  %v1479_v13 = vld [vmem:[#allocation11 + $0x1] ss:$0 sm:$0xff] }
 0x16a   :  { %v399_v28 = vand.u32 2147483647, %v1718_v11  ;;  %vm391_vm9 = vcmp.lt.f32.partialorder %v390_v20, 0.0004427343 }
 0x16b   :  { %1725 = vlog2.f32 %v393_v12  ;;  %v397_v24 = vadd.f32 1.0, %v396_v15  ;;  %v389_v31 = vmul.f32 %v1716_v9, %v388_v19  ;;  %v1710_v9 = vld [vmem:[#allocation10 + $0x48] sm:$0xff]  }
 0x16c   :  { %vm400_vm10 = vcmp.lt.f32.partialorder %v399_v28, 0.0004427343  ;;  %1622 = vmatpush3.bf16.msra.mxu1 %v1710_v9 }
 0x16d   :  { %v398_v38 = vmul.f32 %v1718_v11, %v397_v24 }
 0x16e   :  { %v1720_v14 = vpop.eup %1719 }
 0x16f   :  { %v526_v16 = vadd.f32 1.0, %v1720_v14  ;;  %v529_v25 = vmul.f32 -0.5, %v1720_v14  ;;  %v532_v45 = vand.u32 2147483647, %v1720_v14 }
 0x170   :  { %v1722_v17 = vpop.eup %1721 }
 0x171   :  { %1727 = vlog2.f32 %v526_v16  ;;  %v535_v22 = vadd.f32 1.0, %v1722_v17  ;;  %v538_v33 = vmul.f32 -0.5, %v1722_v17  ;;  %v530_v40 = vadd.f32 1.0, %v529_v25 }
 0x172   :  { %v541_v49 = vand.u32 2147483647, %v1722_v17  ;;  %vm533_vm11 = vcmp.lt.f32.partialorder %v532_v45, 0.0004427343 }
 0x173   :  { %v1724_v26 = vpop.eup %1723  ;;  %1729 = vlog2.f32 %v535_v22  ;;  %v539_v47 = vadd.f32 1.0, %v538_v33  ;;  %v531_v52 = vmul.f32 %v1720_v14, %v530_v40  ;;  %v1711_v40 = vld [vmem:[#allocation10 + $0x70] sm:$0xff]  }
 0x174   :  { %v386_v29 = vmul.f32 0.6931472, %v1724_v26  ;;  %vm542_vm12 = vcmp.lt.f32.partialorder %v541_v49, 0.0004427343  ;;  %v1486_v26 = vld [vmem:[#allocation11 + $0x4] ss:$0 sm:$0xff] }
 0x175   :  { %v1726_v34 = vpop.eup %1725  ;;  %v540_v57 = vmul.f32 %v1722_v17, %v539_v47 }
 0x176   :  { %v392_v36 = vsel %vm391_vm9, %v389_v31, %v386_v29  ;;  %v395_v37 = vmul.f32 0.6931472, %v1726_v34 }
 0x177   :  { %v402_v42 = vadd.f32 %v392_v36, %v374_v35 }
 0x178   :  { %v401_v46 = vsel %vm400_vm10, %v398_v38, %v395_v37 }
 0x179   :  { %v403_v48 = vadd.f32 %v401_v46, %v375_v43  ;;  %v1477_v55 = vadd.f32 -0.6931472, %v402_v42  ;;  %v1712_v42 = vld [vmem:[#allocation10 + $0x78] sm:$0xff]   ;;  %v1494_v43 = vld [vmem:[#allocation11 + $0x2] ss:$0 sm:$0xff] }
 0x17b   :  { %v1728_v54 = vpop.eup %1727  ;;  %v1478_v44 = vadd.f32 -0.6931472, %v403_v48 }
 0x17c   :  { %v528_v56 = vmul.f32 0.6931472, %v1728_v54 }
 0x17d   :  { %v1730_v58 = vpop.eup %1729  ;;  %v407_v60 = vpack.c.bf16 %v1478_v44, %v1477_v55  ;;  %v1917_v55 = vmov 2  }
 0x17e   :  { %v534_v62 = vsel %vm533_vm11, %v531_v52, %v528_v56  ;;  %v537_v3 = vmul.f32 0.6931472, %v1730_v58  ;;  %1695 = vset.pattern.permute.xlu1 %v1917_v55 }
 0x17f   :  { %v544_v4 = vadd.f32 %v534_v62, %v516_v51  ;;  %1589 = vmatmul.mubr.msk.bf16.vlgmr.msra.gmra.mrb[8].mxu0 %vm413_vm3, %v407_v60 }
 0x180   :  { %v543_v59 = vsel %vm542_vm12, %v540_v57, %v537_v3  ;;  %1599 = vmatpush3.bf16.msra.mxu0 %v559_v61  ;;  %1600 = vmatprep.mubr.msk.bf16.mxu0 %vm1914_vm0, %v1913_v0  ;;  %v1918_v61 = vmov 3  }
 0x181   :  { %v1484_v5 = vadd.f32 -0.6931472, %v544_v4  ;;  %v545_v6 = vadd.f32 %v543_v59, %v517_v50  ;;  %1614 = vmatprep.subr.mxu0 %v2092_v41 }
 0x183   :  { %v1485_v7 = vadd.f32 -0.6931472, %v545_v6 }
 0x185   :  { %v549_v8 = vpack.c.bf16 %v1485_v7, %v1484_v5 }
 0x187   :  { %1601 = vmatmul.mubr.msk.bf16.vlgmr.msra.gmra.mrb[12].mxu0 %vm413_vm3, %v549_v8 }
 0x188   :  { %1616 = vmatprep.mubr.msk.f32.mxu0 %vm413_vm3, %v2080_v32  ;;  %1615 = vmatpush3.msra.mxu0 %v2092_v41 }
 0x189   :  { %1627 = vmatprep.subr.bf16.mxu0 %v1913_v0 }
 0x18f   :  { %1617 = vmatmul.mubr.msk.f32.vlgmr.msra.gmra.mrb[16].mxu0 %vm413_vm3, %v2085_v39 }
 0x190   :  { %1631 = vmatprep.mubr.msk.bf16.mxu0 %vm1914_vm0, %v1913_v0  ;;  %1628 = vmatpush3.bf16.msra.mxu0 %v1711_v40 }
 0x191   :  { %1629 = vmatprep.subr.bf16.mxu0 %v1913_v0 }
 0x194   :  { %1630 = vmatpush3.bf16.msra.mxu0 %v1712_v42 }
 0x221   :  { %v1608_v10 = vpop.f32.mrb[12].mxu1 }
 0x222   :  { %v674_v11 = vpop.f32.mrb[13].mxu1 }
 0x225   :  { %v1613_v12 = vpop.f32.mrb[14].mxu1 }
 0x226   :  { %v755_v32 = vpop.f32.mrb[15].mxu1 }
 0x252   :  { %v455_v41 = vpop.f32.mrb[8].mxu0 }
 0x253   :  { %v456_v14 = vadd.f32 %v1479_v13, %v455_v41  ;;  %v1590_v15 = vpop.f32.mrb[9].mxu0 }
 0x254   :  { %v458_v16 = vpop.f32.mrb[10].mxu0 }
 0x255   :  { %v839_v17 = vmul.f32 %v755_v32, %v456_v14  ;;  %v459_v39 = vadd.f32 %v1479_v13, %v458_v16  ;;  %v1591_v19 = vpop.f32.mrb[11].mxu0 }
 0x257   :  { %v840_v20 = vmul.f32 %v1613_v12, %v459_v39 }
 0x259   :  { %v845_v22 = vpack.c.bf16 %v840_v20, %v839_v17 }
 0x25a   :  { %v595_v24 = vpop.f32.mrb[12].mxu0 }
 0x25b   :  { %1624 = vmatmul.mubr.msk.bf16.vlgmr.msra.gmra.mrb[16].mxu1 %vm159_vm1, %v845_v22  ;;  %v1602_v25 = vpop.f32.mrb[13].mxu0  ;;  %v596_v33 = vadd.f32 %v1486_v26, %v595_v24 }
 0x25c   :  { %v598_v28 = vpop.f32.mrb[14].mxu0  ;;  %1639 = vmatprep.mubr.msk.f32.mxu1 %vm1914_vm0, %v1913_v0 }
 0x25d   :  { %v1603_v29 = vpop.f32.mrb[15].mxu0  ;;  %v599_v31 = vadd.f32 %v1486_v26, %v598_v28 }
 0x262   :  { %v1618_v34 = vpop.f32.mrb[16].mxu0 }
 0x263   :  { %v2122_v35 = vmul.f32 %v1618_v34, %v599_v31  ;;  %v830_v36 = vpop.f32.mrb[17].mxu0 }
 0x264   :  { %v2124_v37 = vmul.f32 %v830_v36, %v596_v33 }
 0x266   :  { %v1255_v38 = vpack.c.bf16 %v2122_v35, %v2124_v37 }
 0x32e   :  { %v900_v45 = vpop.f32.mrb[16].mxu1 }
 0x32f   :  { %v901_v46 = vadd.f32 %v1494_v43, %v900_v45  ;;  %v1625_v47 = vpop.f32.mrb[17].mxu1 }
 0x330   :  { %v903_v48 = vpop.f32.mrb[18].mxu1 }
 0x331   :  { %v907_v49 = vmul.f32 %v901_v46, %v674_v11  ;;  %v904_v51 = vadd.f32 %v1494_v43, %v903_v48  ;;  %v1626_v52 = vpop.f32.mrb[19].mxu1 }
 0x333   :  { %v908_v53 = vmul.f32 %v1608_v10, %v904_v51 }
 0x335   :  { %v913_v54 = vpack.c.bf16 %v908_v53, %v907_v49 }
 0x337   :  { %1632 = vmatmul.mubr.msk.bf16.vlgmr.msra.gmra.mrb[20].mxu0 %vm159_vm1, %v913_v54 }
 0x338   :  { %1644 = vmatprep.mubr.msk.f32.mxu0 %vm413_vm3, %v2064_v23 }
 0x40a   :  { %v963_v44 = vpop.f32.mrb[20].mxu0 }
 0x40b   :  { %v2132_v56 = vmul.f32 0.35355338, %v963_v44  ;;  %v1633_v57 = vpop.f32.mrb[21].mxu0 }
 0x40c   :  { %v966_v58 = vpop.f32.mrb[22].mxu0 }
 0x40d   :  { %1029 = vperm.xlu1 %1695, %v2132_v56   ;;  %974 = vperm.xlu0 %1692, %v2132_v56   ;;  %v1634_v60 = vpop.f32.mrb[23].mxu0  ;;  %v2136_v50 = vmul.f32 0.35355338, %v966_v58 }
 0x411   :  { %1696 = vset.pattern.permute.xlu1 %v1915_v1  ;;  %1694 = vset.pattern.permute.xlu0 %v1916_v2 }
 0x412   :  { %1002 = vperm.xlu0 %1694, %v2132_v56   ;;  %979 = vperm.xlu1 %1696, %v2136_v50  }
 0x416   :  { %1698 = vset.pattern.permute.xlu0 %v1917_v55  ;;  %1697 = vset.pattern.permute.xlu1 %v1916_v2 }
 0x417   :  { %1033 = vperm.xlu0 %1698, %v2136_v50   ;;  %1006 = vperm.xlu1 %1697, %v2136_v50  }
 0x41b   :  { %1699 = vset.pattern.permute.xlu1 %v1918_v61  ;;  %1700 = vset.pattern.permute.xlu0 %v1918_v61 }
 0x41c   :  { %1056 = vperm.xlu1 %1699, %v2132_v56  }
 0x420   :  { %1060 = vperm.xlu1 %1699, %v2136_v50  }
 0x48c   :  { %v1030_v1 = vpop.permute.xlu1 %1029  ;;  %v975_v62 = vpop.permute.xlu0 %974 }
 0x48d   :  { %v982_v3 = vsel %vm2057_vm4, %v975_v62, -1e+30  ;;  %v1036_v7 = vsel %vm2057_vm4, %v1030_v1, -1e+30 }
 0x48e   :  { %v984_v5 = vsel %vm413_vm3, %v982_v3, -inf  ;;  %v1038_v12 = vsel %vm413_vm3, %v1036_v7, -inf }
 0x491   :  { %v1003_v4 = vpop.permute.xlu0 %1002  ;;  %v980_v59 = vpop.permute.xlu1 %979 }
 0x492   :  { %v983_v2 = vsel %vm2070_vm6, %v980_v59, -1e+30  ;;  %v1009_v63 = vsel %vm2057_vm4, %v1003_v4, -1e+30 }
 0x493   :  { %v985_v6 = vsel %vm413_vm3, %v983_v2, -inf  ;;  %v1011_v41 = vsel %vm413_vm3, %v1009_v63, -inf }
 0x494   :  { %v986_v8 = vmax.f32 %v984_v5, %v985_v6 }
 0x496   :  { %v987_v9 = vrot.slane %v986_v8, 4  ;;  %v1034_v10 = vpop.permute.xlu0 %1033  ;;  %v1007_v11 = vpop.permute.xlu1 %1006 }
 0x497   :  { %v1037_v32 = vsel %vm2070_vm6, %v1034_v10, -1e+30  ;;  %v1010_v13 = vsel %vm2070_vm6, %v1007_v11, -1e+30  ;;  %v1919_v11 = vmov 0.0|0.0  }
 0x498   :  { %v988_v14 = vmax.f32 %v986_v8, %v987_v9  ;;  %v1039_v15 = vsel %vm413_vm3, %v1037_v32, -inf  ;;  %v1012_v16 = vsel %vm413_vm3, %v1010_v13, -inf  ;;  %1668 = vmatprep.subr.bf16.mxu1 %v1919_v11 }
 0x499   :  { %v1040_v17 = vmax.f32 %v1038_v12, %v1039_v15  ;;  %v1013_v39 = vmax.f32 %v1011_v41, %v1012_v16 }
 0x49a   :  { %v989_v19 = vrot.slane %v988_v14, 2 }
 0x49b   :  { %v1041_v20 = vrot.slane %v1040_v17, 4  ;;  %v1014_v22 = vrot.slane %v1013_v39, 4  ;;  %v1057_v24 = vpop.permute.xlu1 %1056 }
 0x49c   :  { %v990_v25 = vmax.f32 %v988_v14, %v989_v19  ;;  %v1063_v29 = vsel %vm2057_vm4, %v1057_v24, -1e+30 }
 0x49d   :  { %v1042_v26 = vmax.f32 %v1040_v17, %v1041_v20  ;;  %v1015_v28 = vmax.f32 %v1013_v39, %v1014_v22  ;;  %v1065_v43 = vsel %vm413_vm3, %v1063_v29, -inf }
 0x49e   :  { %v991_v31 = vrot.slane %v990_v25, 1 }
 0x49f   :  { %v1043_v33 = vrot.slane %v1042_v26, 2  ;;  %v1016_v34 = vrot.slane %v1015_v28, 2  ;;  %v1061_v36 = vpop.permute.xlu1 %1060 }
 0x4a0   :  { %v1064_v40 = vsel %vm2070_vm6, %v1061_v36, -1e+30  ;;  %v992_v42 = vmax.f32 %v990_v25, %v991_v31  ;;  %v134_v31 = vshrl.u32 %v107_v18, 7 }
 0x4a1   :  { %v1066_v45 = vsel %vm413_vm3, %v1064_v40, -inf  ;;  %v1044_v46 = vmax.f32 %v1042_v26, %v1043_v33  ;;  %v1017_v47 = vmax.f32 %v1015_v28, %v1016_v34  ;;  %v1463_v33 = vld [vmem:[#allocation7] ss:$0 sm:$0xff] }
 0x4a2   :  { %v1067_v48 = vmax.f32 %v1065_v43, %v1066_v45  ;;  %v994_v49 = vmul.f32 %v2077_v30, %v992_v42  ;;  %v993_v21 = vmul.f32 %v2064_v23, %v992_v42  ;;  %vm139_vm4 = vcmp.eq.s32.totalorder %v134_v31, %v1463_v33 }
 0x4a3   :  { %v1045_v51 = vrot.slane %v1044_v46, 1  ;;  %v1018_v52 = vrot.slane %v1017_v47, 1  ;;  %v1464_v42 = vsel %vm139_vm4, 1.0, %v1913_v0 }
 0x4a4   :  { %v1068_v53 = vrot.slane %v1067_v48, 4  ;;  %v998_v54 = vsel %vm413_vm3, %v994_v49, 0.0  ;;  %v995_v27 = vsel %vm413_vm3, %v993_v21, 0.0  ;;  %v1317_v49 = vld [vmem:[#allocation10 + $0x80] sm:$0x3] }
 0x4a5   :  { %999 = vadd.xlane.f32.xlu1 %v998_v54  ;;  %996 = vadd.xlane.f32.xlu0 %v995_v27  ;;  %v1046_v55 = vmax.f32 %v1044_v46, %v1045_v51  ;;  %v1019_v44 = vmax.f32 %v1017_v47, %v1018_v52  ;;  %v1325_v35 = vsel %vm1323_vm5, %v1317_v49, 0  ;;  %v1504_v54 = vld [vmem:[#allocation11 + $0x5] ss:$0 sm:$0xff] }
 0x4a6   :  { %v1069_v57 = vmax.f32 %v1067_v48, %v1068_v53 }
 0x4a7   :  { %v1047_v58 = vmul.f32 %v2064_v23, %v1046_v55  ;;  %v1020_v60 = vmul.f32 %v2064_v23, %v1019_v44  ;;  %v1021_v3 = vmul.f32 %v2077_v30, %v1019_v44  ;;  %v1048_v5 = vmul.f32 %v2077_v30, %v1046_v55 }
 0x4a8   :  { %v1070_v61 = vrot.slane %v1069_v57, 2 }
 0x4a9   :  { %v1049_v1 = vsel %vm413_vm3, %v1047_v58, 0.0  ;;  %v1022_v62 = vsel %vm413_vm3, %v1020_v60, 0.0  ;;  %v1025_v2 = vsel %vm413_vm3, %v1021_v3, 0.0  ;;  %v1052_v8 = vsel %vm413_vm3, %v1048_v5, 0.0 }
 0x4aa   :  { %1050 = vadd.xlane.f32.xlu1 %v1049_v1  ;;  %1023 = vadd.xlane.f32.xlu0 %v1022_v62  ;;  %v1071_v4 = vmax.f32 %v1069_v57, %v1070_v61 }
 0x4ac   :  { %v1072_v59 = vrot.slane %v1071_v4, 1 }
 0x4ae   :  { %1026 = vadd.xlane.f32.xlu0 %v1025_v2  ;;  %v1073_v6 = vmax.f32 %v1071_v4, %v1072_v59 }
 0x4b0   :  { %v1074_v7 = vmul.f32 %v2064_v23, %v1073_v6  ;;  %v1075_v63 = vmul.f32 %v2077_v30, %v1073_v6 }
 0x4b2   :  { %1053 = vadd.xlane.f32.xlu0 %v1052_v8  ;;  %v1076_v9 = vsel %vm413_vm3, %v1074_v7, 0.0  ;;  %v1079_v10 = vsel %vm413_vm3, %v1075_v63, 0.0 }
 0x4b3   :  { %1077 = vadd.xlane.f32.xlu1 %v1076_v9 }
 0x4b6   :  { %1080 = vadd.xlane.f32.xlu0 %v1079_v10 }
 0x532   :  { %v997_v12 = vpop.xlane.xlu0 %996  ;;  %v1000_v32 = vpop.xlane.xlu1 %999 }
 0x537   :  { %v1024_v13 = vpop.xlane.xlu0 %1023  ;;  %v1051_v14 = vpop.xlane.xlu1 %1050 }
 0x538   :  { %v1083_v23 = vsel %vm1082_vm13, %v997_v12, %v1024_v13 }
 0x539   :  { %v1086_v16 = vsel %vm1085_vm14, %v1083_v23, %v1051_v14 }
 0x53b   :  { %v1027_v41 = vpop.xlane.xlu0 %1026 }
 0x53c   :  { %v1084_v19 = vsel %vm1082_vm13, %v1000_v32, %v1027_v41 }
 0x53f   :  { %v1054_v15 = vpop.xlane.xlu0 %1053 }
 0x540   :  { %v1078_v17 = vpop.xlane.xlu1 %1077  ;;  %v1087_v22 = vsel %vm1085_vm14, %v1084_v19, %v1054_v15 }
 0x541   :  { %v1089_v39 = vsel %vm1088_vm15, %v1086_v16, %v1078_v17 }
 0x542   :  { %v1091_v20 = vsub.f32 %v2132_v56, %v1089_v39  ;;  %v1713_v56 = vld [vmem:[#allocation10 + $0x60] sm:$0xff]  }
 0x543   :  { %v1081_v24 = vpop.xlane.xlu0 %1080 }
 0x544   :  { %v1093_v25 = vmul.f32 1.442695, %v1091_v20  ;;  %v1090_v26 = vsel %vm1088_vm15, %v1087_v22, %v1081_v24 }
 0x545   :  { %v1092_v28 = vsub.f32 %v2136_v50, %v1090_v26  ;;  %v1714_v50 = vld [vmem:[#allocation10 + $0x68] sm:$0xff]  }
 0x546   :  { %1731 = vpow2.f32 %v1093_v25 }
 0x547   :  { %v1095_v29 = vmul.f32 1.442695, %v1092_v28 }
 0x549   :  { %1733 = vpow2.f32 %v1095_v29 }
 0x550   :  { %v1732_v34 = vpop.eup %1731 }
 0x553   :  { %v1734_v36 = vpop.eup %1733 }
 0x554   :  { %v1669_v40 = vpack.c.bf16 %v1734_v36, %v1732_v34 }
 0x556   :  { %1670 = vmatpush3.bf16.msra.mxu1 %v1669_v40 }
 0x557   :  { %1647 = vmatprep.subr.bf16.mxu1 %v1913_v0 }
 0x559   :  { %1640 = vmatmul.mubr.msk.f32.vlgmr.msra.gmra.mrb[20].mxu1 %vm329_vm2, %v1464_v42 }
 0x55a   :  { %1648 = vmatpush3.bf16.msra.mxu1 %v1713_v56  ;;  %1651 = vmatprep.mubr.msk.bf16.mxu1 %vm1914_vm0, %v1913_v0 }
 0x55b   :  { %1649 = vmatprep.subr.bf16.mxu1 %v1913_v0 }
 0x55e   :  { %1650 = vmatpush3.bf16.msra.mxu1 %v1714_v50 }
 0x561   :  { %1652 = vmatmul.mubr.msk.bf16.vlgmr.msra.gmra.mrb[24].mxu1 %vm159_vm1, %v1255_v38 }
 0x62c   :  { %v1166_v18 = vpop.f32.mrb[20].mxu1 }
 0x62d   :  { %v1641_v43 = vpop.f32.mrb[21].mxu1  ;;  %1642 = vmatprep.subr.mxu0 %v1166_v18 }
 0x62e   :  { %1643 = vmatpush3.msra.mxu0 %v1166_v18 }
 0x62f   :  { %1645 = vmatmul.mubr.msk.f32.vlgmr.msra.gmra.mrb[18].mxu0 %vm413_vm3, %v2077_v30  ;;  %1655 = vmatprep.subr.bf16.mxu0 %v1913_v0  ;;  %vm1319_vm3 = vcmask 31744  }
 0x630   :  { %1657 = vmatprep.mubr.msk.bf16.mxu0 %vm1914_vm0, %v1913_v0  ;;  %1656 = vmatpush3.bf16.msra.mxu0 %v1325_v35 }
 0x631   :  { %1671 = vmatprep.subr.bf16.mxu0 %v1919_v11 }
 0x634   :  { %v1310_v45 = vpop.f32.mrb[24].mxu1 }
 0x635   :  { %v1653_v46 = vpop.f32.mrb[25].mxu1  ;;  %v1311_v27 = vadd.f32 %v1504_v54, %v1310_v45 }
 0x636   :  { %v1313_v47 = vpop.f32.mrb[26].mxu1 }
 0x637   :  { %v1654_v48 = vpop.f32.mrb[27].mxu1  ;;  %v1314_v44 = vadd.f32 %v1504_v54, %v1313_v47 }
 0x702   :  { %v1646_v37 = vpop.f32.mrb[18].mxu0 }
 0x703   :  { %1735 = vrcp.f32 %v1646_v37  ;;  %v1236_v38 = vpop.f32.mrb[19].mxu0 }
 0x704   :  { %1737 = vrcp.f32 %v1236_v38 }
 0x70d   :  { %v1736_v21 = vpop.eup %1735 }
 0x70e   :  { %v1738_v30 = vpop.eup %1737  ;;  %v1248_v51 = vmul.f32 %v1736_v21, %v1734_v36 }
 0x70f   :  { %v1246_v52 = vmul.f32 %v1738_v30, %v1732_v34 }
 0x711   :  { %v1318_v53 = vpack.c.bf16 %v1248_v51, %v1246_v52 }
 0x713   :  { %1658 = vmatmul.mubr.msk.bf16.vlgmr.msra.gmra.mrb[24].mxu0 %vm1319_vm3, %v1318_v53 }
 0x714   :  { %1665 = vmatprep.mubr.msk.f32.mxu0 %vm1914_vm0, %v1913_v0 }
 0x7e6   :  { %v1361_v55 = vpop.f32.mrb[24].mxu0 }
 0x7e7   :  { %v1368_v57 = vmul.f32 %v1361_v55, %v1311_v27  ;;  %v1659_v58 = vpop.f32.mrb[25].mxu0 }
 0x7e8   :  { %v1364_v60 = vpop.f32.mrb[26].mxu0 }
 0x7e9   :  { %v1369_v61 = vmul.f32 %v1364_v60, %v1314_v44  ;;  %v1660_v1 = vpop.f32.mrb[27].mxu0 }
 0x7eb   :  { %v1672_v62 = vpack.c.bf16 %v1369_v61, %v1368_v57 }
 0x7ed   :  { %1673 = vmatpush3.bf16.msra.mxu0 %v1672_v62 }
 0x7f0   :  { %1666 = vmatmul.mubr.msk.f32.vlgmr.msra.gmra.mrb[28].mxu0 %vm329_vm2, %v1464_v42 }
 0x8c3   :  { %v1436_v3 = vpop.f32.mrb[28].mxu0 }
 0x8c4   :  { %1440 = vst.msk [vmem:[#allocation13] sm:$0xff] %vm159_vm1, %v1436_v3  ;;  %v1667_v0 = vpop.f32.mrb[29].mxu0 }
 0x8c5   :  { %1882 = shalt.err (!%p1879_p10)
}
 0x8c6   :  { %s1883_s21 = scalar_lea.hbm %s2227_s6, 128 }
 0x8c7   :  { %p1884_p11 = scmp.ne.s32.totalorder %s2227_s6, %s1883_s21  ;;  %p1887_p12 = scmp.lt.u32.totalorder %s1883_s21, %s2227_s6 }
 0x8c9   :  { %p1889_p13 = pnand %p1887_p12, %p1884_p11 }
 0x8cb   :  { %1892 = shalt.err (!%p1889_p13)
}
 0x8cc   :  { %1450 = dma.vmem_to_hbm [thread:$0]  %s1448_s19, 128, %s2227_s6, [#allocation4]  }
 0x8cd   :  { %1901 = dma.done.wait [#allocation4], 128  }
 0x8ce   :  { %1902 = vsyncadd [#allocation4], 4294967168 }
 0x8cf   :  { %1454 = vsyncpa [#allocation3], 1 }
 0x8d0   :  { %1455 = vsyncpa [#allocation6], 1 }
 0x8d1   :  { %1456 = vsyncpa [#allocation9], 1 }
 0x8d2   :  { %1457 = vsyncpa [#allocation12], 1 }
 0x8d3   :  { %1458 = vsyncpa [#allocation4], 1 }

</bundles_post_ra>
